<compile_context>
chip_gen: v7x
topology: tpu7x:2x2x1
jax: 0.10.0
libtpu: 0.0.40
codegen_flags: <defaults>
</compile_context>

<pallas_src>
import jax
import jax.numpy as jnp
from jax.experimental import pallas as pl
from jax.experimental.pallas import tpu as pltpu

HIDDEN = 20
LANES = 128


def mlp_kernel(params_ref, x_ref, o_ref):
    # params_ref: SMEM f32[3*HIDDEN + 1] = [w1(20) | b1(20) | w2(20) | b2(1)]
    # x_ref, o_ref: (block_rows, 128) lane-dense tiles. Each element is an
    # independent scalar input to the 1->20->1 MLP.
    x = x_ref[...]
    acc = jnp.zeros_like(x)
    # Fully unrolled 20-step loop: pure VPU fma/max, MXU stays idle.
    for j in range(HIDDEN):
        w1j = params_ref[j]
        b1j = params_ref[HIDDEN + j]
        w2j = params_ref[2 * HIDDEN + j]
        acc = acc + w2j * jnp.maximum(x * w1j + b1j, 0.0)
    o_ref[...] = acc + params_ref[3 * HIDDEN]  # + b2


def net_forward(x, w1, b1, w2, b2, *, block_rows=256):
    """Pallas forward pass of Net.

    x:  (N, 1) float32
    w1: (20, 1)  hidden.weight (torch layout), b1: (20,)
    w2: (1, 20)  predict.weight (torch layout), b2: (1,)
    returns (N, 1) float32
    """
    N = x.shape[0]

    # Pack all parameters into one small SMEM-resident vector.
    params = jnp.concatenate([
        w1.reshape(-1).astype(jnp.float32),
        b1.reshape(-1).astype(jnp.float32),
        w2.reshape(-1).astype(jnp.float32),
        b2.reshape(-1).astype(jnp.float32),
    ])  # (61,)

    # Lane-dense layout: flatten to (rows, 128); pad rows to a multiple of the
    # block height (itself a multiple of 8 to satisfy the (8,128) rule).
    block_rows = max(8, (block_rows // 8) * 8)
    rows = pl.cdiv(N, LANES)
    br = max(8, min(block_rows, pl.cdiv(rows, 8) * 8))
    rows_pad = pl.cdiv(rows, br) * br
    total = rows_pad * LANES

    x_flat = jnp.pad(x.reshape(-1).astype(jnp.float32), (0, total - N))
    x2d = x_flat.reshape(rows_pad, LANES)

    out2d = pl.pallas_call(
        mlp_kernel,
        out_shape=jax.ShapeDtypeStruct((rows_pad, LANES), jnp.float32),
        grid_spec=pltpu.PrefetchScalarGridSpec(
            num_scalar_prefetch=0,
            grid=(rows_pad // br,),
            in_specs=[
                # Packed params: whole array resident in SMEM across the grid.
                pl.BlockSpec(memory_space=pltpu.MemorySpace.SMEM),
                # Lane-dense input tile.
                pl.BlockSpec((br, LANES), lambda i: (i, 0)),
            ],
            out_specs=pl.BlockSpec((br, LANES), lambda i: (i, 0)),
        ),
        compiler_params=pltpu.CompilerParams(
            dimension_semantics=("parallel",),  # v7x: shard batch across 2 TCs
        ),
    )(params, x2d)

    return out2d.reshape(-1)[:N].reshape(N, 1)


def init_params(key):
    """Deterministic init matching torch.nn.Linear shapes (uniform +-1/sqrt(fan_in))."""
    k1, k2, k3, k4 = jax.random.split(key, 4)
    # hidden: Linear(1, 20) -> weight (20, 1), bias (20,)
    bound1 = 1.0  # 1/sqrt(1)
    w1 = jax.random.uniform(k1, (HIDDEN, 1), jnp.float32, -bound1, bound1)
    b1 = jax.random.uniform(k2, (HIDDEN,), jnp.float32, -bound1, bound1)
    # predict: Linear(20, 1) -> weight (1, 20), bias (1,)
    bound2 = 1.0 / jnp.sqrt(float(HIDDEN))
    w2 = jax.random.uniform(k3, (1, HIDDEN), jnp.float32, -bound2, bound2)
    b2 = jax.random.uniform(k4, (1,), jnp.float32, -bound2, bound2)
    return w1, b1, w2, b2


if __name__ == "__main__":
    key = jax.random.PRNGKey(0)
    w1, b1, w2, b2 = init_params(key)

    # Same input as the PyTorch spec: torch.unsqueeze(torch.linspace(-1, 1, 1000), 1)
    N = 1000
    x = jnp.linspace(-1.0, 1.0, N, dtype=jnp.float32).reshape(N, 1)

    y = net_forward(x, w1, b1, w2, b2)
    y = jax.block_until_ready(y)

    # Pure-JAX reference.
    h_ref = jnp.maximum(x @ w1.T + b1[None, :], 0.0)
    y_ref = h_ref @ w2.T + b2[None, :]

    assert y.shape == (N, 1)
    assert jnp.allclose(y, y_ref, atol=1e-5, rtol=1e-5), float(
        jnp.max(jnp.abs(y - y_ref))
    )
    print("KERNEL_OK")
</pallas_src>

<mosaic_0001>
module attributes {stable_mosaic.version = 11 : i64} {
  func.func @mlp_kernel(%arg0: i32, %arg1: memref<61xf32, #tpu.memory_space<smem>>, %arg2: memref<8x128xf32, #tpu.memory_space<vmem>>, %arg3: memref<8x128xf32, #tpu.memory_space<vmem>>) attributes {dimension_semantics = [#tpu.dimension_semantics<parallel>], iteration_bounds = array<i64: 1>, scalar_prefetch = 0 : i64, scratch_operands = 0 : i64, tpu.core_type = #tpu.core_type<tc>, window_params = [{transform_indices = @transform_0, window_bounds = array<i64: 61>}, {transform_indices = @transform_1, window_bounds = array<i64: 8, 128>}, {transform_indices = @transform_2, window_bounds = array<i64: 8, 128>}]} {
    %c0 = arith.constant 0 : index
    %c0_0 = arith.constant 0 : index
    %0 = vector.load %arg2[%c0, %c0_0] : memref<8x128xf32, #tpu.memory_space<vmem>>, vector<8x128xf32>
    %cst = arith.constant 0.000000e+00 : f32
    %1 = vector.broadcast %cst : f32 to vector<8x128xf32>
    %c0_1 = arith.constant 0 : index
    %2 = memref.load %arg1[%c0_1] : memref<61xf32, #tpu.memory_space<smem>>
    %c20 = arith.constant 20 : index
    %3 = memref.load %arg1[%c20] : memref<61xf32, #tpu.memory_space<smem>>
    %c40 = arith.constant 40 : index
    %4 = memref.load %arg1[%c40] : memref<61xf32, #tpu.memory_space<smem>>
    %5 = vector.broadcast %2 : f32 to vector<8x128xf32>
    %6 = arith.mulf %0, %5 : vector<8x128xf32>
    %7 = vector.broadcast %3 : f32 to vector<8x128xf32>
    %8 = arith.addf %6, %7 : vector<8x128xf32>
    %cst_2 = arith.constant 0.000000e+00 : f32
    %9 = vector.broadcast %cst_2 : f32 to vector<8x128xf32>
    %10 = arith.maximumf %8, %9 : vector<8x128xf32>
    %11 = vector.broadcast %4 : f32 to vector<8x128xf32>
    %12 = arith.mulf %11, %10 : vector<8x128xf32>
    %13 = arith.addf %1, %12 : vector<8x128xf32>
    %c1 = arith.constant 1 : index
    %14 = memref.load %arg1[%c1] : memref<61xf32, #tpu.memory_space<smem>>
    %c21 = arith.constant 21 : index
    %15 = memref.load %arg1[%c21] : memref<61xf32, #tpu.memory_space<smem>>
    %c41 = arith.constant 41 : index
    %16 = memref.load %arg1[%c41] : memref<61xf32, #tpu.memory_space<smem>>
    %17 = vector.broadcast %14 : f32 to vector<8x128xf32>
    %18 = arith.mulf %0, %17 : vector<8x128xf32>
    %19 = vector.broadcast %15 : f32 to vector<8x128xf32>
    %20 = arith.addf %18, %19 : vector<8x128xf32>
    %cst_3 = arith.constant 0.000000e+00 : f32
    %21 = vector.broadcast %cst_3 : f32 to vector<8x128xf32>
    %22 = arith.maximumf %20, %21 : vector<8x128xf32>
    %23 = vector.broadcast %16 : f32 to vector<8x128xf32>
    %24 = arith.mulf %23, %22 : vector<8x128xf32>
    %25 = arith.addf %13, %24 : vector<8x128xf32>
    %c2 = arith.constant 2 : index
    %26 = memref.load %arg1[%c2] : memref<61xf32, #tpu.memory_space<smem>>
    %c22 = arith.constant 22 : index
    %27 = memref.load %arg1[%c22] : memref<61xf32, #tpu.memory_space<smem>>
    %c42 = arith.constant 42 : index
    %28 = memref.load %arg1[%c42] : memref<61xf32, #tpu.memory_space<smem>>
    %29 = vector.broadcast %26 : f32 to vector<8x128xf32>
    %30 = arith.mulf %0, %29 : vector<8x128xf32>
    %31 = vector.broadcast %27 : f32 to vector<8x128xf32>
    %32 = arith.addf %30, %31 : vector<8x128xf32>
    %cst_4 = arith.constant 0.000000e+00 : f32
    %33 = vector.broadcast %cst_4 : f32 to vector<8x128xf32>
    %34 = arith.maximumf %32, %33 : vector<8x128xf32>
    %35 = vector.broadcast %28 : f32 to vector<8x128xf32>
    %36 = arith.mulf %35, %34 : vector<8x128xf32>
    %37 = arith.addf %25, %36 : vector<8x128xf32>
    %c3 = arith.constant 3 : index
    %38 = memref.load %arg1[%c3] : memref<61xf32, #tpu.memory_space<smem>>
    %c23 = arith.constant 23 : index
    %39 = memref.load %arg1[%c23] : memref<61xf32, #tpu.memory_space<smem>>
    %c43 = arith.constant 43 : index
    %40 = memref.load %arg1[%c43] : memref<61xf32, #tpu.memory_space<smem>>
    %41 = vector.broadcast %38 : f32 to vector<8x128xf32>
    %42 = arith.mulf %0, %41 : vector<8x128xf32>
    %43 = vector.broadcast %39 : f32 to vector<8x128xf32>
    %44 = arith.addf %42, %43 : vector<8x128xf32>
    %cst_5 = arith.constant 0.000000e+00 : f32
    %45 = vector.broadcast %cst_5 : f32 to vector<8x128xf32>
    %46 = arith.maximumf %44, %45 : vector<8x128xf32>
    %47 = vector.broadcast %40 : f32 to vector<8x128xf32>
    %48 = arith.mulf %47, %46 : vector<8x128xf32>
    %49 = arith.addf %37, %48 : vector<8x128xf32>
    %c4 = arith.constant 4 : index
    %50 = memref.load %arg1[%c4] : memref<61xf32, #tpu.memory_space<smem>>
    %c24 = arith.constant 24 : index
    %51 = memref.load %arg1[%c24] : memref<61xf32, #tpu.memory_space<smem>>
    %c44 = arith.constant 44 : index
    %52 = memref.load %arg1[%c44] : memref<61xf32, #tpu.memory_space<smem>>
    %53 = vector.broadcast %50 : f32 to vector<8x128xf32>
    %54 = arith.mulf %0, %53 : vector<8x128xf32>
    %55 = vector.broadcast %51 : f32 to vector<8x128xf32>
    %56 = arith.addf %54, %55 : vector<8x128xf32>
    %cst_6 = arith.constant 0.000000e+00 : f32
    %57 = vector.broadcast %cst_6 : f32 to vector<8x128xf32>
    %58 = arith.maximumf %56, %57 : vector<8x128xf32>
    %59 = vector.broadcast %52 : f32 to vector<8x128xf32>
    %60 = arith.mulf %59, %58 : vector<8x128xf32>
    %61 = arith.addf %49, %60 : vector<8x128xf32>
    %c5 = arith.constant 5 : index
    %62 = memref.load %arg1[%c5] : memref<61xf32, #tpu.memory_space<smem>>
    %c25 = arith.constant 25 : index
    %63 = memref.load %arg1[%c25] : memref<61xf32, #tpu.memory_space<smem>>
    %c45 = arith.constant 45 : index
    %64 = memref.load %arg1[%c45] : memref<61xf32, #tpu.memory_space<smem>>
    %65 = vector.broadcast %62 : f32 to vector<8x128xf32>
    %66 = arith.mulf %0, %65 : vector<8x128xf32>
    %67 = vector.broadcast %63 : f32 to vector<8x128xf32>
    %68 = arith.addf %66, %67 : vector<8x128xf32>
    %cst_7 = arith.constant 0.000000e+00 : f32
    %69 = vector.broadcast %cst_7 : f32 to vector<8x128xf32>
    %70 = arith.maximumf %68, %69 : vector<8x128xf32>
    %71 = vector.broadcast %64 : f32 to vector<8x128xf32>
    %72 = arith.mulf %71, %70 : vector<8x128xf32>
    %73 = arith.addf %61, %72 : vector<8x128xf32>
    %c6 = arith.constant 6 : index
    %74 = memref.load %arg1[%c6] : memref<61xf32, #tpu.memory_space<smem>>
    %c26 = arith.constant 26 : index
    %75 = memref.load %arg1[%c26] : memref<61xf32, #tpu.memory_space<smem>>
    %c46 = arith.constant 46 : index
    %76 = memref.load %arg1[%c46] : memref<61xf32, #tpu.memory_space<smem>>
    %77 = vector.broadcast %74 : f32 to vector<8x128xf32>
    %78 = arith.mulf %0, %77 : vector<8x128xf32>
    %79 = vector.broadcast %75 : f32 to vector<8x128xf32>
    %80 = arith.addf %78, %79 : vector<8x128xf32>
    %cst_8 = arith.constant 0.000000e+00 : f32
    %81 = vector.broadcast %cst_8 : f32 to vector<8x128xf32>
    %82 = arith.maximumf %80, %81 : vector<8x128xf32>
    %83 = vector.broadcast %76 : f32 to vector<8x128xf32>
    %84 = arith.mulf %83, %82 : vector<8x128xf32>
    %85 = arith.addf %73, %84 : vector<8x128xf32>
    %c7 = arith.constant 7 : index
    %86 = memref.load %arg1[%c7] : memref<61xf32, #tpu.memory_space<smem>>
    %c27 = arith.constant 27 : index
    %87 = memref.load %arg1[%c27] : memref<61xf32, #tpu.memory_space<smem>>
    %c47 = arith.constant 47 : index
    %88 = memref.load %arg1[%c47] : memref<61xf32, #tpu.memory_space<smem>>
    %89 = vector.broadcast %86 : f32 to vector<8x128xf32>
    %90 = arith.mulf %0, %89 : vector<8x128xf32>
    %91 = vector.broadcast %87 : f32 to vector<8x128xf32>
    %92 = arith.addf %90, %91 : vector<8x128xf32>
    %cst_9 = arith.constant 0.000000e+00 : f32
    %93 = vector.broadcast %cst_9 : f32 to vector<8x128xf32>
    %94 = arith.maximumf %92, %93 : vector<8x128xf32>
    %95 = vector.broadcast %88 : f32 to vector<8x128xf32>
    %96 = arith.mulf %95, %94 : vector<8x128xf32>
    %97 = arith.addf %85, %96 : vector<8x128xf32>
    %c8 = arith.constant 8 : index
    %98 = memref.load %arg1[%c8] : memref<61xf32, #tpu.memory_space<smem>>
    %c28 = arith.constant 28 : index
    %99 = memref.load %arg1[%c28] : memref<61xf32, #tpu.memory_space<smem>>
    %c48 = arith.constant 48 : index
    %100 = memref.load %arg1[%c48] : memref<61xf32, #tpu.memory_space<smem>>
    %101 = vector.broadcast %98 : f32 to vector<8x128xf32>
    %102 = arith.mulf %0, %101 : vector<8x128xf32>
    %103 = vector.broadcast %99 : f32 to vector<8x128xf32>
    %104 = arith.addf %102, %103 : vector<8x128xf32>
    %cst_10 = arith.constant 0.000000e+00 : f32
    %105 = vector.broadcast %cst_10 : f32 to vector<8x128xf32>
    %106 = arith.maximumf %104, %105 : vector<8x128xf32>
    %107 = vector.broadcast %100 : f32 to vector<8x128xf32>
    %108 = arith.mulf %107, %106 : vector<8x128xf32>
    %109 = arith.addf %97, %108 : vector<8x128xf32>
    %c9 = arith.constant 9 : index
    %110 = memref.load %arg1[%c9] : memref<61xf32, #tpu.memory_space<smem>>
    %c29 = arith.constant 29 : index
    %111 = memref.load %arg1[%c29] : memref<61xf32, #tpu.memory_space<smem>>
    %c49 = arith.constant 49 : index
    %112 = memref.load %arg1[%c49] : memref<61xf32, #tpu.memory_space<smem>>
    %113 = vector.broadcast %110 : f32 to vector<8x128xf32>
    %114 = arith.mulf %0, %113 : vector<8x128xf32>
    %115 = vector.broadcast %111 : f32 to vector<8x128xf32>
    %116 = arith.addf %114, %115 : vector<8x128xf32>
    %cst_11 = arith.constant 0.000000e+00 : f32
    %117 = vector.broadcast %cst_11 : f32 to vector<8x128xf32>
    %118 = arith.maximumf %116, %117 : vector<8x128xf32>
    %119 = vector.broadcast %112 : f32 to vector<8x128xf32>
    %120 = arith.mulf %119, %118 : vector<8x128xf32>
    %121 = arith.addf %109, %120 : vector<8x128xf32>
    %c10 = arith.constant 10 : index
    %122 = memref.load %arg1[%c10] : memref<61xf32, #tpu.memory_space<smem>>
    %c30 = arith.constant 30 : index
    %123 = memref.load %arg1[%c30] : memref<61xf32, #tpu.memory_space<smem>>
    %c50 = arith.constant 50 : index
    %124 = memref.load %arg1[%c50] : memref<61xf32, #tpu.memory_space<smem>>
    %125 = vector.broadcast %122 : f32 to vector<8x128xf32>
    %126 = arith.mulf %0, %125 : vector<8x128xf32>
    %127 = vector.broadcast %123 : f32 to vector<8x128xf32>
    %128 = arith.addf %126, %127 : vector<8x128xf32>
    %cst_12 = arith.constant 0.000000e+00 : f32
    %129 = vector.broadcast %cst_12 : f32 to vector<8x128xf32>
    %130 = arith.maximumf %128, %129 : vector<8x128xf32>
    %131 = vector.broadcast %124 : f32 to vector<8x128xf32>
    %132 = arith.mulf %131, %130 : vector<8x128xf32>
    %133 = arith.addf %121, %132 : vector<8x128xf32>
    %c11 = arith.constant 11 : index
    %134 = memref.load %arg1[%c11] : memref<61xf32, #tpu.memory_space<smem>>
    %c31 = arith.constant 31 : index
    %135 = memref.load %arg1[%c31] : memref<61xf32, #tpu.memory_space<smem>>
    %c51 = arith.constant 51 : index
    %136 = memref.load %arg1[%c51] : memref<61xf32, #tpu.memory_space<smem>>
    %137 = vector.broadcast %134 : f32 to vector<8x128xf32>
    %138 = arith.mulf %0, %137 : vector<8x128xf32>
    %139 = vector.broadcast %135 : f32 to vector<8x128xf32>
    %140 = arith.addf %138, %139 : vector<8x128xf32>
    %cst_13 = arith.constant 0.000000e+00 : f32
    %141 = vector.broadcast %cst_13 : f32 to vector<8x128xf32>
    %142 = arith.maximumf %140, %141 : vector<8x128xf32>
    %143 = vector.broadcast %136 : f32 to vector<8x128xf32>
    %144 = arith.mulf %143, %142 : vector<8x128xf32>
    %145 = arith.addf %133, %144 : vector<8x128xf32>
    %c12 = arith.constant 12 : index
    %146 = memref.load %arg1[%c12] : memref<61xf32, #tpu.memory_space<smem>>
    %c32 = arith.constant 32 : index
    %147 = memref.load %arg1[%c32] : memref<61xf32, #tpu.memory_space<smem>>
    %c52 = arith.constant 52 : index
    %148 = memref.load %arg1[%c52] : memref<61xf32, #tpu.memory_space<smem>>
    %149 = vector.broadcast %146 : f32 to vector<8x128xf32>
    %150 = arith.mulf %0, %149 : vector<8x128xf32>
    %151 = vector.broadcast %147 : f32 to vector<8x128xf32>
    %152 = arith.addf %150, %151 : vector<8x128xf32>
    %cst_14 = arith.constant 0.000000e+00 : f32
    %153 = vector.broadcast %cst_14 : f32 to vector<8x128xf32>
    %154 = arith.maximumf %152, %153 : vector<8x128xf32>
    %155 = vector.broadcast %148 : f32 to vector<8x128xf32>
    %156 = arith.mulf %155, %154 : vector<8x128xf32>
    %157 = arith.addf %145, %156 : vector<8x128xf32>
    %c13 = arith.constant 13 : index
    %158 = memref.load %arg1[%c13] : memref<61xf32, #tpu.memory_space<smem>>
    %c33 = arith.constant 33 : index
    %159 = memref.load %arg1[%c33] : memref<61xf32, #tpu.memory_space<smem>>
    %c53 = arith.constant 53 : index
    %160 = memref.load %arg1[%c53] : memref<61xf32, #tpu.memory_space<smem>>
    %161 = vector.broadcast %158 : f32 to vector<8x128xf32>
    %162 = arith.mulf %0, %161 : vector<8x128xf32>
    %163 = vector.broadcast %159 : f32 to vector<8x128xf32>
    %164 = arith.addf %162, %163 : vector<8x128xf32>
    %cst_15 = arith.constant 0.000000e+00 : f32
    %165 = vector.broadcast %cst_15 : f32 to vector<8x128xf32>
    %166 = arith.maximumf %164, %165 : vector<8x128xf32>
    %167 = vector.broadcast %160 : f32 to vector<8x128xf32>
    %168 = arith.mulf %167, %166 : vector<8x128xf32>
    %169 = arith.addf %157, %168 : vector<8x128xf32>
    %c14 = arith.constant 14 : index
    %170 = memref.load %arg1[%c14] : memref<61xf32, #tpu.memory_space<smem>>
    %c34 = arith.constant 34 : index
    %171 = memref.load %arg1[%c34] : memref<61xf32, #tpu.memory_space<smem>>
    %c54 = arith.constant 54 : index
    %172 = memref.load %arg1[%c54] : memref<61xf32, #tpu.memory_space<smem>>
    %173 = vector.broadcast %170 : f32 to vector<8x128xf32>
    %174 = arith.mulf %0, %173 : vector<8x128xf32>
    %175 = vector.broadcast %171 : f32 to vector<8x128xf32>
    %176 = arith.addf %174, %175 : vector<8x128xf32>
    %cst_16 = arith.constant 0.000000e+00 : f32
    %177 = vector.broadcast %cst_16 : f32 to vector<8x128xf32>
    %178 = arith.maximumf %176, %177 : vector<8x128xf32>
    %179 = vector.broadcast %172 : f32 to vector<8x128xf32>
    %180 = arith.mulf %179, %178 : vector<8x128xf32>
    %181 = arith.addf %169, %180 : vector<8x128xf32>
    %c15 = arith.constant 15 : index
    %182 = memref.load %arg1[%c15] : memref<61xf32, #tpu.memory_space<smem>>
    %c35 = arith.constant 35 : index
    %183 = memref.load %arg1[%c35] : memref<61xf32, #tpu.memory_space<smem>>
    %c55 = arith.constant 55 : index
    %184 = memref.load %arg1[%c55] : memref<61xf32, #tpu.memory_space<smem>>
    %185 = vector.broadcast %182 : f32 to vector<8x128xf32>
    %186 = arith.mulf %0, %185 : vector<8x128xf32>
    %187 = vector.broadcast %183 : f32 to vector<8x128xf32>
    %188 = arith.addf %186, %187 : vector<8x128xf32>
    %cst_17 = arith.constant 0.000000e+00 : f32
    %189 = vector.broadcast %cst_17 : f32 to vector<8x128xf32>
    %190 = arith.maximumf %188, %189 : vector<8x128xf32>
    %191 = vector.broadcast %184 : f32 to vector<8x128xf32>
    %192 = arith.mulf %191, %190 : vector<8x128xf32>
    %193 = arith.addf %181, %192 : vector<8x128xf32>
    %c16 = arith.constant 16 : index
    %194 = memref.load %arg1[%c16] : memref<61xf32, #tpu.memory_space<smem>>
    %c36 = arith.constant 36 : index
    %195 = memref.load %arg1[%c36] : memref<61xf32, #tpu.memory_space<smem>>
    %c56 = arith.constant 56 : index
    %196 = memref.load %arg1[%c56] : memref<61xf32, #tpu.memory_space<smem>>
    %197 = vector.broadcast %194 : f32 to vector<8x128xf32>
    %198 = arith.mulf %0, %197 : vector<8x128xf32>
    %199 = vector.broadcast %195 : f32 to vector<8x128xf32>
    %200 = arith.addf %198, %199 : vector<8x128xf32>
    %cst_18 = arith.constant 0.000000e+00 : f32
    %201 = vector.broadcast %cst_18 : f32 to vector<8x128xf32>
    %202 = arith.maximumf %200, %201 : vector<8x128xf32>
    %203 = vector.broadcast %196 : f32 to vector<8x128xf32>
    %204 = arith.mulf %203, %202 : vector<8x128xf32>
    %205 = arith.addf %193, %204 : vector<8x128xf32>
    %c17 = arith.constant 17 : index
    %206 = memref.load %arg1[%c17] : memref<61xf32, #tpu.memory_space<smem>>
    %c37 = arith.constant 37 : index
    %207 = memref.load %arg1[%c37] : memref<61xf32, #tpu.memory_space<smem>>
    %c57 = arith.constant 57 : index
    %208 = memref.load %arg1[%c57] : memref<61xf32, #tpu.memory_space<smem>>
    %209 = vector.broadcast %206 : f32 to vector<8x128xf32>
    %210 = arith.mulf %0, %209 : vector<8x128xf32>
    %211 = vector.broadcast %207 : f32 to vector<8x128xf32>
    %212 = arith.addf %210, %211 : vector<8x128xf32>
    %cst_19 = arith.constant 0.000000e+00 : f32
    %213 = vector.broadcast %cst_19 : f32 to vector<8x128xf32>
    %214 = arith.maximumf %212, %213 : vector<8x128xf32>
    %215 = vector.broadcast %208 : f32 to vector<8x128xf32>
    %216 = arith.mulf %215, %214 : vector<8x128xf32>
    %217 = arith.addf %205, %216 : vector<8x128xf32>
    %c18 = arith.constant 18 : index
    %218 = memref.load %arg1[%c18] : memref<61xf32, #tpu.memory_space<smem>>
    %c38 = arith.constant 38 : index
    %219 = memref.load %arg1[%c38] : memref<61xf32, #tpu.memory_space<smem>>
    %c58 = arith.constant 58 : index
    %220 = memref.load %arg1[%c58] : memref<61xf32, #tpu.memory_space<smem>>
    %221 = vector.broadcast %218 : f32 to vector<8x128xf32>
    %222 = arith.mulf %0, %221 : vector<8x128xf32>
    %223 = vector.broadcast %219 : f32 to vector<8x128xf32>
    %224 = arith.addf %222, %223 : vector<8x128xf32>
    %cst_20 = arith.constant 0.000000e+00 : f32
    %225 = vector.broadcast %cst_20 : f32 to vector<8x128xf32>
    %226 = arith.maximumf %224, %225 : vector<8x128xf32>
    %227 = vector.broadcast %220 : f32 to vector<8x128xf32>
    %228 = arith.mulf %227, %226 : vector<8x128xf32>
    %229 = arith.addf %217, %228 : vector<8x128xf32>
    %c19 = arith.constant 19 : index
    %230 = memref.load %arg1[%c19] : memref<61xf32, #tpu.memory_space<smem>>
    %c39 = arith.constant 39 : index
    %231 = memref.load %arg1[%c39] : memref<61xf32, #tpu.memory_space<smem>>
    %c59 = arith.constant 59 : index
    %232 = memref.load %arg1[%c59] : memref<61xf32, #tpu.memory_space<smem>>
    %233 = vector.broadcast %230 : f32 to vector<8x128xf32>
    %234 = arith.mulf %0, %233 : vector<8x128xf32>
    %235 = vector.broadcast %231 : f32 to vector<8x128xf32>
    %236 = arith.addf %234, %235 : vector<8x128xf32>
    %cst_21 = arith.constant 0.000000e+00 : f32
    %237 = vector.broadcast %cst_21 : f32 to vector<8x128xf32>
    %238 = arith.maximumf %236, %237 : vector<8x128xf32>
    %239 = vector.broadcast %232 : f32 to vector<8x128xf32>
    %240 = arith.mulf %239, %238 : vector<8x128xf32>
    %241 = arith.addf %229, %240 : vector<8x128xf32>
    %c60 = arith.constant 60 : index
    %242 = memref.load %arg1[%c60] : memref<61xf32, #tpu.memory_space<smem>>
    %243 = vector.broadcast %242 : f32 to vector<8x128xf32>
    %244 = arith.addf %241, %243 : vector<8x128xf32>
    %c0_22 = arith.constant 0 : index
    %c0_23 = arith.constant 0 : index
    %245 = vector.load %arg3[%c0_22, %c0_23] : memref<8x128xf32, #tpu.memory_space<vmem>>, vector<8x128xf32>
    tpu.vector_store %arg3[%c0_22, %c0_23], %244 {strides = array<i32>} : memref<8x128xf32, #tpu.memory_space<vmem>>, vector<8x128xf32>,
    return
  }
  func.func @transform_0(%arg0: i32) -> i32 {
    %c0_i32 = arith.constant 0 : i32
    %c0_i32_0 = arith.constant 0 : i32
    return %c0_i32 : i32
  }
  func.func @transform_1(%arg0: i32) -> (i32, i32) {
    %c0_i32 = arith.constant 0 : i32
    %c0_i32_0 = arith.constant 0 : i32
    return %arg0, %c0_i32 : i32, i32
  }
  func.func @transform_2(%arg0: i32) -> (i32, i32) {
    %c0_i32 = arith.constant 0 : i32
    %c0_i32_0 = arith.constant 0 : i32
    return %arg0, %c0_i32 : i32, i32
  }
}

</mosaic_0001>

<bundles_post_ra>
// kernel: tpu_custom_call.1
= control target key start
LH: loop header
LB: loop body
LE: loop exit
PB: predicated region body
PF: predicated region fallthrough
CT: control target
= control target key end

     0   :  { %7 = vsyncpa [#allocation5], 0  ;;  %s637_s0 = inlined_call_operand.hbm [shape: f32[61], index: 0, kind: input, shape index: {}]   ;;  %s638_s1 = inlined_call_operand.hbm [shape: f32[8,128], index: 1, kind: input, shape index: {}]   ;;  %s639_s2 = inlined_call_operand.hbm [shape: f32[8,128], index: 2, kind: output, shape index: {}]  }
   0x1   :  { %8 = vsyncpa [#allocation3], 0 }
   0x2   :  { %9 = vsyncpa [#allocation4], 0  ;;  %s339_s11 = scalar_lea.hbm %s637_s0, 16 }
   0x3   :  { %p340_p0 = scmp.ne.s32.totalorder %s637_s0, %s339_s11  ;;  %p343_p1 = scmp.lt.u32.totalorder %s339_s11, %s637_s0 }
   0x5   :  { %p345_p2 = pnand %p343_p1, %p340_p0 }
   0x7   :  { %348 = shalt.err (!%p345_p2)
}
   0x8   :  { %s399_s16 = smov [#allocation2]   ;;  %s400_s19 = smov [#allocation6]  }
   0x9   :  { %17 = dma.hbm_to_smem %s637_s0, 16, %s399_s16, [#allocation5]  }
   0xa   :  { %s24_s20 = sshll.u32 %s400_s19, 4  ;;  %s349_s23 = scalar_lea.hbm %s638_s1, 128  ;;  %s25_s20 = int_to_ptr.vmem [resolvable:$true] %s24_s20 }
   0xb   :  { %p350_p3 = scmp.ne.s32.totalorder %s638_s1, %s349_s23  ;;  %p353_p4 = scmp.lt.u32.totalorder %s349_s23, %s638_s1 }
   0xd   :  { %p355_p5 = pnand %p353_p4, %p350_p3 }
   0xf   :  { %358 = shalt.err (!%p355_p5)
}
  0x10   :  { %s359_s28 = scalar_lea.vmem %s25_s20, 128  ;;  %p364_p7 = scmp.lt.s32.totalorder %s25_s20, %s25_s20 }
  0x11   :  { %p360_p6 = scmp.ne.s32.totalorder %s25_s20, %s359_s28  ;;  %p365_p8 = scmp.lt.s32.totalorder %s359_s28, %s359_s28 }
  0x13   :  { %p366_p9 = por %p365_p8, %p364_p7 }
  0x15   :  { %p367_p10 = pnand %p366_p9, %p360_p6 }
  0x17   :  { %370 = shalt.err (!%p367_p10)
}
  0x18   :  { %27 = dma.hbm_to_vmem [thread:$0]  %s638_s1, 128, %s25_s20, [#allocation3]  }
  0x19   :  { %393 = dma.done.wait [#allocation5], 16  }
  0x1a   :  { %394 = vsyncadd [#allocation5], 4294967280 }
  0x1b   :  { %395 = dma.done.wait [#allocation3], 128  }
  0x1c   :  { %396 = vsyncadd [#allocation3], 4294967168 }
  0x1d   :  { %34 = sfence }
  0x1e   :  { %s36_s30 = sld [smem:[#allocation2]]  ;;  %s276_s3 = sld [smem:[#allocation2 + $0x14]]  ;;  %v447_v0 = vld [vmem:[#allocation6] sm:$0xff] }
  0x1f   :  { %s441_s4 = sld [smem:[#allocation2 + $0x28]]  ;;  %s278_s5 = sld [smem:[#allocation2 + $0x1]] }
  0x20   :  { %s279_s6 = sld [smem:[#allocation2 + $0x15]]  ;;  %s443_s7 = sld [smem:[#allocation2 + $0x29]] }
  0x21   :  { %s281_s8 = sld [smem:[#allocation2 + $0x2]]  ;;  %s445_s9 = sld [smem:[#allocation2 + $0x16]] }
  0x22   :  { %s449_s10 = sld [smem:[#allocation2 + $0x2a]]  ;;  %s284_s1 = sld [smem:[#allocation2 + $0x3]] }
  0x23   :  { %s451_s11 = sld [smem:[#allocation2 + $0x17]]  ;;  %s453_s12 = sld [smem:[#allocation2 + $0x2b]] }
  0x24   :  { %v39_v1 = vstv %s36_s30  ;;  %v41_v2 = vstv %s276_s3  ;;  %s455_s13 = sld [smem:[#allocation2 + $0x4]]  ;;  %s457_s14 = sld [smem:[#allocation2 + $0x18]] }
  0x25   :  { %v40_v3 = vmul.f32 %v39_v1, %v447_v0  ;;  %v50_v4 = vstv %s278_s5  ;;  %s460_s15 = sld [smem:[#allocation2 + $0x2c]]  ;;  %s462_s16 = sld [smem:[#allocation2 + $0x5]]  ;;  %v44_v8 = vstv %s441_s4 }
  0x26   :  { %v51_v5 = vmul.f32 %v50_v4, %v447_v0  ;;  %v52_v6 = vstv %s279_s6  ;;  %s465_s17 = sld [smem:[#allocation2 + $0x19]]  ;;  %s469_s18 = sld [smem:[#allocation2 + $0x6]]  ;;  %v55_v12 = vstv %s443_s7 }
  0x27   :  { %v42_v7 = vadd.f32 %v41_v2, %v40_v3  ;;  %v61_v9 = vstv %s281_s8  ;;  %v63_v10 = vstv %s445_s9  ;;  %s471_s19 = sld [smem:[#allocation2 + $0x1a]]  ;;  %s475_s20 = sld [smem:[#allocation2 + $0x2d]] }
  0x28   :  { %v53_v11 = vadd.f32 %v52_v6, %v51_v5  ;;  %v62_v13 = vmul.f32 %v61_v9, %v447_v0  ;;  %v72_v14 = vstv %s284_s1  ;;  %s477_s21 = sld [smem:[#allocation2 + $0x7]]  ;;  %v66_v16 = vstv %s449_s10  ;;  %s482_s22 = sld [smem:[#allocation2 + $0x2e]] }
  0x29   :  { %v43_v15 = vmax.f32 %v42_v7, 0.0  ;;  %v73_v17 = vmul.f32 %v72_v14, %v447_v0  ;;  %v74_v18 = vstv %s451_s11  ;;  %s484_s23 = sld [smem:[#allocation2 + $0x1b]]  ;;  %s488_s24 = sld [smem:[#allocation2 + $0x8]]  ;;  %v77_v25 = vstv %s453_s12 }
  0x2a   :  { %v54_v19 = vmax.f32 %v53_v11, 0.0  ;;  %v64_v20 = vadd.f32 %v63_v10, %v62_v13  ;;  %v83_v21 = vstv %s455_s13  ;;  %v85_v22 = vstv %s457_s14  ;;  %s490_s25 = sld [smem:[#allocation2 + $0x1c]]  ;;  %s494_s26 = sld [smem:[#allocation2 + $0x2f]] }
  0x2b   :  { %v45_v23 = vmul.f32 %v44_v8, %v43_v15  ;;  %v75_v24 = vadd.f32 %v74_v18, %v73_v17  ;;  %v84_v26 = vmul.f32 %v83_v21, %v447_v0  ;;  %v94_v29 = vstv %s462_s16  ;;  %s498_s27 = sld [smem:[#allocation2 + $0x9]]  ;;  %s500_s28 = sld [smem:[#allocation2 + $0x1d]] }
  0x2c   :  { %v56_v27 = vmul.f32 %v55_v12, %v54_v19  ;;  %v65_v28 = vmax.f32 %v64_v20, 0.0  ;;  %v96_v30 = vstv %s465_s17  ;;  %v88_v33 = vstv %s460_s15  ;;  %s504_s0 = sld [smem:[#allocation2 + $0x30]]  ;;  %s508_s29 = sld [smem:[#allocation2 + $0xa]] }
  0x2d   :  { %v76_v31 = vmax.f32 %v75_v24, 0.0  ;;  %v86_v32 = vadd.f32 %v85_v22, %v84_v26  ;;  %v95_v34 = vmul.f32 %v94_v29, %v447_v0  ;;  %v105_v37 = vstv %s469_s18  ;;  %s510_s30 = sld [smem:[#allocation2 + $0x1e]]  ;;  %s513_s3 = sld [smem:[#allocation2 + $0x31]] }
  0x2e   :  { %v57_v35 = vadd.f32 %v56_v27, %v45_v23  ;;  %v67_v36 = vmul.f32 %v66_v16, %v65_v28  ;;  %v107_v38 = vstv %s471_s19  ;;  %v106_v42 = vmul.f32 %v105_v37, %v447_v0  ;;  %s518_s4 = sld [smem:[#allocation2 + $0xb]]  ;;  %s520_s5 = sld [smem:[#allocation2 + $0x1f]] }
  0x2f   :  { %v78_v39 = vmul.f32 %v77_v25, %v76_v31  ;;  %v87_v40 = vmax.f32 %v86_v32, 0.0  ;;  %v97_v41 = vadd.f32 %v96_v30, %v95_v34  ;;  %v99_v44 = vstv %s475_s20  ;;  %s523_s6 = sld [smem:[#allocation2 + $0x32]]  ;;  %s528_s7 = sld [smem:[#allocation2 + $0xc]] }
  0x30   :  { %v68_v43 = vadd.f32 %v67_v36, %v57_v35  ;;  %v116_v45 = vstv %s477_s21  ;;  %v118_v46 = vstv %s484_s23  ;;  %v108_v49 = vadd.f32 %v107_v38, %v106_v42  ;;  %s530_s8 = sld [smem:[#allocation2 + $0x20]]  ;;  %s533_s9 = sld [smem:[#allocation2 + $0x33]] }
  0x31   :  { %v89_v47 = vmul.f32 %v88_v33, %v87_v40  ;;  %v98_v48 = vmax.f32 %v97_v41, 0.0  ;;  %v117_v50 = vmul.f32 %v116_v45, %v447_v0  ;;  %v110_v52 = vstv %s482_s22  ;;  %s538_s10 = sld [smem:[#allocation2 + $0xd]]  ;;  %s540_s1 = sld [smem:[#allocation2 + $0x21]] }
  0x32   :  { %v79_v51 = vadd.f32 %v78_v39, %v68_v43  ;;  %v127_v53 = vstv %s488_s24  ;;  %v129_v54 = vstv %s490_s25  ;;  %v109_v56 = vmax.f32 %v108_v49, 0.0  ;;  %s543_s11 = sld [smem:[#allocation2 + $0x34]]  ;;  %s548_s12 = sld [smem:[#allocation2 + $0xe]] }
  0x33   :  { %v100_v55 = vmul.f32 %v99_v44, %v98_v48  ;;  %v119_v57 = vadd.f32 %v118_v46, %v117_v50  ;;  %v128_v58 = vmul.f32 %v127_v53, %v447_v0  ;;  %v121_v60 = vstv %s494_s26  ;;  %s550_s13 = sld [smem:[#allocation2 + $0x22]]  ;;  %s553_s14 = sld [smem:[#allocation2 + $0x35]] }
  0x34   :  { %v90_v59 = vadd.f32 %v89_v47, %v79_v51  ;;  %v138_v61 = vstv %s498_s27  ;;  %v140_v62 = vstv %s500_s28  ;;  %v111_v63 = vmul.f32 %v110_v52, %v109_v56  ;;  %s558_s15 = sld [smem:[#allocation2 + $0xf]]  ;;  %s560_s16 = sld [smem:[#allocation2 + $0x23]] }
  0x35   :  { %v120_v1 = vmax.f32 %v119_v57, 0.0  ;;  %v130_v2 = vadd.f32 %v129_v54, %v128_v58  ;;  %v139_v3 = vmul.f32 %v138_v61, %v447_v0  ;;  %v132_v5 = vstv %s504_s0  ;;  %s563_s17 = sld [smem:[#allocation2 + $0x36]]  ;;  %s568_s18 = sld [smem:[#allocation2 + $0x10]] }
  0x36   :  { %v101_v4 = vadd.f32 %v100_v55, %v90_v59  ;;  %v149_v6 = vstv %s508_s29  ;;  %v151_v7 = vstv %s510_s30  ;;  %v143_v13 = vstv %s513_s3  ;;  %s570_s19 = sld [smem:[#allocation2 + $0x24]]  ;;  %s573_s20 = sld [smem:[#allocation2 + $0x37]] }
  0x37   :  { %v122_v8 = vmul.f32 %v121_v60, %v120_v1  ;;  %v131_v9 = vmax.f32 %v130_v2, 0.0  ;;  %v141_v10 = vadd.f32 %v140_v62, %v139_v3  ;;  %v150_v11 = vmul.f32 %v149_v6, %v447_v0  ;;  %s578_s21 = sld [smem:[#allocation2 + $0x11]]  ;;  %s580_s22 = sld [smem:[#allocation2 + $0x25]] }
  0x38   :  { %v112_v12 = vadd.f32 %v111_v63, %v101_v4  ;;  %v160_v14 = vstv %s518_s4  ;;  %v162_v15 = vstv %s520_s5  ;;  %v154_v21 = vstv %s523_s6  ;;  %s583_s23 = sld [smem:[#allocation2 + $0x38]]  ;;  %s588_s24 = sld [smem:[#allocation2 + $0x12]] }
  0x39   :  { %v133_v16 = vmul.f32 %v132_v5, %v131_v9  ;;  %v142_v17 = vmax.f32 %v141_v10, 0.0  ;;  %v152_v18 = vadd.f32 %v151_v7, %v150_v11  ;;  %v161_v19 = vmul.f32 %v160_v14, %v447_v0  ;;  %s590_s25 = sld [smem:[#allocation2 + $0x26]]  ;;  %s593_s26 = sld [smem:[#allocation2 + $0x39]] }
  0x3a   :  { %v123_v20 = vadd.f32 %v122_v8, %v112_v12  ;;  %v171_v22 = vstv %s528_s7  ;;  %v173_v23 = vstv %s530_s8  ;;  %v165_v29 = vstv %s533_s9  ;;  %s598_s27 = sld [smem:[#allocation2 + $0x13]]  ;;  %s600_s28 = sld [smem:[#allocation2 + $0x27]] }
  0x3b   :  { %v144_v24 = vmul.f32 %v143_v13, %v142_v17  ;;  %v153_v25 = vmax.f32 %v152_v18, 0.0  ;;  %v163_v26 = vadd.f32 %v162_v15, %v161_v19  ;;  %v172_v27 = vmul.f32 %v171_v22, %v447_v0  ;;  %s606_s0 = sld [smem:[#allocation2 + $0x3a]]  ;;  %s612_s29 = sld [smem:[#allocation2 + $0x3b]] }
  0x3c   :  { %v134_v28 = vadd.f32 %v133_v16, %v123_v20  ;;  %v182_v30 = vstv %s538_s10  ;;  %v184_v31 = vstv %s540_s1  ;;  %v176_v37 = vstv %s543_s11  ;;  %s335_s30 = sld [smem:[#allocation2 + $0x3c]]  ;;  %s401_s3 = smov [#allocation7]  }
  0x3d   :  { %v155_v32 = vmul.f32 %v154_v21, %v153_v25  ;;  %v164_v33 = vmax.f32 %v163_v26, 0.0  ;;  %v174_v34 = vadd.f32 %v173_v23, %v172_v27  ;;  %v183_v35 = vmul.f32 %v182_v30, %v447_v0  ;;  %s266_s4 = sshll.u32 %s401_s3, 4  ;;  %s267_s4 = int_to_ptr.vmem [resolvable:$true] %s266_s4 }
  0x3e   :  { %v145_v36 = vadd.f32 %v144_v24, %v134_v28  ;;  %v193_v38 = vstv %s548_s12  ;;  %v195_v39 = vstv %s550_s13  ;;  %v187_v45 = vstv %s553_s14  ;;  %s371_s5 = scalar_lea.vmem %s267_s4, 128  ;;  %p376_p12 = scmp.lt.s32.totalorder %s267_s4, %s267_s4 }
  0x3f   :  { %v166_v40 = vmul.f32 %v165_v29, %v164_v33  ;;  %v175_v41 = vmax.f32 %v174_v34, 0.0  ;;  %v185_v42 = vadd.f32 %v184_v31, %v183_v35  ;;  %v194_v43 = vmul.f32 %v193_v38, %v447_v0  ;;  %p372_p11 = scmp.ne.s32.totalorder %s267_s4, %s371_s5  ;;  %p377_p13 = scmp.lt.s32.totalorder %s371_s5, %s371_s5 }
  0x40   :  { %v156_v44 = vadd.f32 %v155_v32, %v145_v36  ;;  %v204_v46 = vstv %s558_s15  ;;  %v206_v47 = vstv %s560_s16  ;;  %v198_v53 = vstv %s563_s17 }
  0x41   :  { %v177_v48 = vmul.f32 %v176_v37, %v175_v41  ;;  %v186_v49 = vmax.f32 %v185_v42, 0.0  ;;  %v196_v50 = vadd.f32 %v195_v39, %v194_v43  ;;  %v205_v51 = vmul.f32 %v204_v46, %v447_v0  ;;  %p378_p0 = por %p377_p13, %p376_p12 }
  0x42   :  { %v167_v52 = vadd.f32 %v166_v40, %v156_v44  ;;  %v215_v54 = vstv %s568_s18  ;;  %v217_v55 = vstv %s570_s19  ;;  %v209_v61 = vstv %s573_s20 }
  0x43   :  { %v188_v56 = vmul.f32 %v187_v45, %v186_v49  ;;  %v197_v57 = vmax.f32 %v196_v50, 0.0  ;;  %v207_v58 = vadd.f32 %v206_v47, %v205_v51  ;;  %v216_v59 = vmul.f32 %v215_v54, %v447_v0  ;;  %p379_p1 = pnand %p378_p0, %p372_p11 }
  0x44   :  { %v178_v60 = vadd.f32 %v177_v48, %v167_v52  ;;  %v226_v62 = vstv %s578_s21  ;;  %v228_v63 = vstv %s580_s22  ;;  %v220_v6 = vstv %s583_s23 }
  0x45   :  { %v199_v1 = vmul.f32 %v198_v53, %v197_v57  ;;  %v208_v2 = vmax.f32 %v207_v58, 0.0  ;;  %v218_v3 = vadd.f32 %v217_v55, %v216_v59  ;;  %v227_v4 = vmul.f32 %v226_v62, %v447_v0 }
  0x46   :  { %v189_v5 = vadd.f32 %v188_v56, %v178_v60  ;;  %v237_v7 = vstv %s588_s24  ;;  %v239_v8 = vstv %s590_s25  ;;  %v231_v14 = vstv %s593_s26 }
  0x47   :  { %v210_v9 = vmul.f32 %v209_v61, %v208_v2  ;;  %v219_v10 = vmax.f32 %v218_v3, 0.0  ;;  %v229_v11 = vadd.f32 %v228_v63, %v227_v4  ;;  %v238_v12 = vmul.f32 %v237_v7, %v447_v0 }
  0x48   :  { %v200_v13 = vadd.f32 %v199_v1, %v189_v5  ;;  %v248_v15 = vstv %s598_s27  ;;  %v250_v16 = vstv %s600_s28  ;;  %v242_v22 = vstv %s606_s0 }
  0x49   :  { %v221_v17 = vmul.f32 %v220_v6, %v219_v10  ;;  %v230_v18 = vmax.f32 %v229_v11, 0.0  ;;  %v240_v19 = vadd.f32 %v239_v8, %v238_v12  ;;  %v249_v20 = vmul.f32 %v248_v15, %v447_v0 }
  0x4a   :  { %v211_v21 = vadd.f32 %v210_v9, %v200_v13  ;;  %v253_v27 = vstv %s612_s29  ;;  %v257_v33 = vstv %s335_s30 }
  0x4b   :  { %v232_v23 = vmul.f32 %v231_v14, %v230_v18  ;;  %v241_v24 = vmax.f32 %v240_v19, 0.0  ;;  %v251_v25 = vadd.f32 %v250_v16, %v249_v20 }
  0x4c   :  { %v222_v26 = vadd.f32 %v221_v17, %v211_v21 }
  0x4d   :  { %v243_v28 = vmul.f32 %v242_v22, %v241_v24  ;;  %v252_v29 = vmax.f32 %v251_v25, 0.0 }
  0x4e   :  { %v233_v30 = vadd.f32 %v232_v23, %v222_v26 }
  0x4f   :  { %v254_v31 = vmul.f32 %v253_v27, %v252_v29 }
  0x50   :  { %v244_v32 = vadd.f32 %v243_v28, %v233_v30 }
  0x52   :  { %v255_v34 = vadd.f32 %v254_v31, %v244_v32 }
  0x54   :  { %v258_v35 = vadd.f32 %v257_v33, %v255_v34 }
  0x56   :  { %259 = vst [vmem:[#allocation7] sm:$0xff] %v258_v35 }
  0x57   :  { %382 = shalt.err (!%p379_p1)
}
  0x58   :  { %s383_s8 = scalar_lea.hbm %s639_s2, 128 }
  0x59   :  { %p384_p2 = scmp.ne.s32.totalorder %s639_s2, %s383_s8  ;;  %p387_p3 = scmp.lt.u32.totalorder %s383_s8, %s639_s2 }
  0x5b   :  { %p389_p4 = pnand %p387_p3, %p384_p2 }
  0x5d   :  { %392 = shalt.err (!%p389_p4)
}
  0x5e   :  { %269 = dma.vmem_to_hbm [thread:$0]  %s267_s4, 128, %s639_s2, [#allocation4]  }
  0x5f   :  { %397 = dma.done.wait [#allocation4], 128  }
  0x60   :  { %398 = vsyncadd [#allocation4], 4294967168 }
  0x61   :  { %273 = vsyncpa [#allocation3], 1 }
  0x62   :  { %274 = vsyncpa [#allocation4], 1 }
  0x63   :  { %275 = vsyncpa [#allocation5], 1 }

</bundles_post_ra>
